<compile_context>
chip_gen: v6e
topology: v6e:2x2x1
jax: 0.10.0
libtpu: 0.0.40
codegen_flags: <defaults>
</compile_context>

<pallas_src>
import functools

import jax
import jax.numpy as jnp
from jax import lax
from jax.experimental import pallas as pl
from jax.experimental.pallas import tpu as pltpu

IN_FEATURES = 24
OUT_FEATURES = 2
_LANE = 128  # TPU lane width: last dims pad to this in tiled layouts.


def _round_up(n, m):
    return ((n + m - 1) // m) * m


def _default_block_b():
    """Per-generation default batch tile (rows)."""
    try:
        kind = jax.devices()[0].device_kind.lower()
    except Exception:
        return 16384
    if "v5" in kind:   # v5e: keep the double-buffered footprint modest.
        return 8192
    return 16384       # v6e / v7x: bigger tiles to amortise per-step overhead.


def lr_kernel(x_ref, w_ref, b_ref, o_ref):
    # x_ref: (tb, 24), w_ref: (2, 24), b_ref: (1, 2), o_ref: (tb, 2)
    x = x_ref[...]
    w = w_ref[...]
    b = b_ref[...]
    # (tb, 24) . (2, 24), contracting K=24 on the last dim of both operands
    # (native trans_b on the MXU) -> (tb, 2) logits accumulated in f32.
    logits = lax.dot_general(
        x, w,
        dimension_numbers=(((1,), (1,)), ((), ())),
        preferred_element_type=jnp.float32,
    ) + b
    o_ref[...] = jax.nn.sigmoid(logits).astype(o_ref.dtype)


@functools.partial(jax.jit, static_argnames=("block_b",))
def _lr_forward(x, weight, bias, *, block_b):
    B = x.shape[0]

    # Balanced batch tiling: split B into the minimal number of <= block_b
    # steps of nearly equal size, each a multiple of 8 sublanes.  A single
    # full block is used when B fits (block == full array dims is always OK).
    n_steps = pl.cdiv(B, block_b)
    if n_steps <= 1:
        tb = B
    else:
        tb = min(block_b, _round_up(pl.cdiv(B, n_steps), 8))
    grid = (pl.cdiv(B, tb),)

    b2d = bias.reshape(1, OUT_FEATURES)

    # Scoped-VMEM budget: double-buffered x and out tiles (both lane-padded to
    # 128 in VMEM) plus headroom for W/b and compiler scratch.
    itemsize = x.dtype.itemsize
    tile_rows = _round_up(tb, 8)
    x_buf = tile_rows * _LANE * itemsize
    o_buf = tile_rows * _LANE * itemsize
    vmem_limit = max(2 * (x_buf + o_buf) + (8 << 20), 16 << 20)

    # Advisory cost estimate using lane-padded HBM traffic.
    bytes_accessed = (
        B * _LANE * itemsize                              # read x  (24 -> 128)
        + OUT_FEATURES * _LANE * weight.dtype.itemsize    # read W
        + _LANE * bias.dtype.itemsize                     # read b
        + B * _LANE * itemsize                            # write out (2 -> 128)
    )
    cost = pl.CostEstimate(
        flops=2 * B * IN_FEATURES * OUT_FEATURES,
        transcendentals=2 * B * OUT_FEATURES,   # sigmoid ~ exp + reciprocal
        bytes_accessed=int(bytes_accessed),
    )

    return pl.pallas_call(
        lr_kernel,
        out_shape=jax.ShapeDtypeStruct((B, OUT_FEATURES), x.dtype),
        grid=grid,
        in_specs=[
            pl.BlockSpec((tb, IN_FEATURES), lambda i: (i, 0)),            # x tiles
            pl.BlockSpec((OUT_FEATURES, IN_FEATURES), lambda i: (0, 0)),  # resident W
            pl.BlockSpec((1, OUT_FEATURES), lambda i: (0, 0)),            # resident b
        ],
        out_specs=pl.BlockSpec((tb, OUT_FEATURES), lambda i: (i, 0)),
        compiler_params=pltpu.CompilerParams(
            dimension_semantics=("parallel",),
            vmem_limit_bytes=int(vmem_limit),
        ),
        cost_estimate=cost,
    )(x, weight, b2d)


def lr_forward(x, weight, bias, *, block_b=None):
    """x: (B, 24), weight: (2, 24), bias: (2,) -> (B, 2) = sigmoid(x @ W^T + b)."""
    if block_b is None:
        block_b = _default_block_b()
    return _lr_forward(x, weight, bias, block_b=int(block_b))


if __name__ == "__main__":
    key = jax.random.PRNGKey(0)
    kx, kw, kb, kx2 = jax.random.split(key, 4)

    # Deterministic init matching nn.Linear default: U(-1/sqrt(fan_in), +1/sqrt(fan_in))
    bound = 1.0 / (IN_FEATURES ** 0.5)
    weight = jax.random.uniform(
        kw, (OUT_FEATURES, IN_FEATURES), minval=-bound, maxval=bound, dtype=jnp.float32
    )
    bias = jax.random.uniform(
        kb, (OUT_FEATURES,), minval=-bound, maxval=bound, dtype=jnp.float32
    )

    # Small batch (single full block, auto per-generation block_b).
    B = 8
    x = jax.random.normal(kx, (B, IN_FEATURES), dtype=jnp.float32)
    out = lr_forward(x, weight, bias)
    jax.block_until_ready(out)
    ref = jax.nn.sigmoid(x @ weight.T + bias)
    assert out.shape == (B, OUT_FEATURES)
    assert jnp.allclose(out, ref, atol=1e-5, rtol=1e-5)

    # Larger batch exercising the balanced multi-step grid + a partial last tile
    # (600 with block_b=512 -> two tiles of 304 rows, last one partially masked).
    B2 = 600
    x2 = jax.random.normal(kx2, (B2, IN_FEATURES), dtype=jnp.float32)
    out2 = lr_forward(x2, weight, bias, block_b=512)
    jax.block_until_ready(out2)
    ref2 = jax.nn.sigmoid(x2 @ weight.T + bias)
    assert out2.shape == (B2, OUT_FEATURES)
    assert jnp.allclose(out2, ref2, atol=1e-5, rtol=1e-5)

    print("KERNEL_OK")
</pallas_src>

<mosaic_0001>
module attributes {stable_mosaic.version = 11 : i64} {
  func.func @lr_kernel(%arg0: i32, %arg1: memref<8x24xf32, #tpu.memory_space<vmem>>, %arg2: memref<2x24xf32, #tpu.memory_space<vmem>>, %arg3: memref<1x2xf32, #tpu.memory_space<vmem>>, %arg4: memref<8x2xf32, #tpu.memory_space<vmem>>) attributes {dimension_semantics = [#tpu.dimension_semantics<parallel>], iteration_bounds = array<i64: 1>, scalar_prefetch = 0 : i64, scratch_operands = 0 : i64, tpu.core_type = #tpu.core_type<tc>, window_params = [{transform_indices = @transform_0, window_bounds = array<i64: 8, 24>}, {pipeline_mode = #tpu.pipeline_mode<synchronous>, transform_indices = @transform_1, window_bounds = array<i64: 2, 24>}, {pipeline_mode = #tpu.pipeline_mode<synchronous>, transform_indices = @transform_2, window_bounds = array<i64: 1, 2>}, {transform_indices = @transform_3, window_bounds = array<i64: 8, 2>}]} {
    %c0 = arith.constant 0 : index
    %c0_0 = arith.constant 0 : index
    %0 = vector.load %arg1[%c0, %c0_0] : memref<8x24xf32, #tpu.memory_space<vmem>>, vector<8x24xf32>
    %c0_1 = arith.constant 0 : index
    %c0_2 = arith.constant 0 : index
    %1 = vector.load %arg2[%c0_1, %c0_2] : memref<2x24xf32, #tpu.memory_space<vmem>>, vector<2x24xf32>
    %c0_3 = arith.constant 0 : index
    %c0_4 = arith.constant 0 : index
    %2 = vector.load %arg3[%c0_3, %c0_4] : memref<1x2xf32, #tpu.memory_space<vmem>>, vector<1x2xf32>
    %cst = arith.constant dense<0.000000e+00> : vector<8x2xf32>
    %3 = tpu.matmul %0, %1, %cst {dimension_numbers = #tpu.dot_dimension_numbers<[1], [1], [0], [0], [0, 0, 1, 0], [], []>} : vector<8x24xf32>, vector<2x24xf32>, vector<8x2xf32> -> vector<8x2xf32>
    %4 = vector.broadcast %2 : vector<1x2xf32> to vector<8x2xf32>
    %5 = arith.addf %3, %4 : vector<8x2xf32>
    %6 = arith.negf %5 : vector<8x2xf32>
    %7 = math.exp %6 : vector<8x2xf32>
    %cst_5 = arith.constant 1.000000e+00 : f32
    %8 = vector.broadcast %cst_5 : f32 to vector<8x2xf32>
    %9 = arith.addf %8, %7 : vector<8x2xf32>
    %10 = arith.divf %8, %9 : vector<8x2xf32>
    %c0_6 = arith.constant 0 : index
    %c0_7 = arith.constant 0 : index
    %11 = vector.load %arg4[%c0_6, %c0_7] : memref<8x2xf32, #tpu.memory_space<vmem>>, vector<8x2xf32>
    tpu.vector_store %arg4[%c0_6, %c0_7], %10 {strides = array<i32>} : memref<8x2xf32, #tpu.memory_space<vmem>>, vector<8x2xf32>,
    return
  }
  func.func @transform_0(%arg0: i32) -> (i32, i32) {
    %c0_i32 = arith.constant 0 : i32
    %c0_i32_0 = arith.constant 0 : i32
    return %arg0, %c0_i32 : i32, i32
  }
  func.func @transform_1(%arg0: i32) -> (i32, i32) {
    %c0_i32 = arith.constant 0 : i32
    %c0_i32_0 = arith.constant 0 : i32
    %c0_i32_1 = arith.constant 0 : i32
    return %c0_i32, %c0_i32_0 : i32, i32
  }
  func.func @transform_2(%arg0: i32) -> (i32, i32) {
    %c0_i32 = arith.constant 0 : i32
    %c0_i32_0 = arith.constant 0 : i32
    %c0_i32_1 = arith.constant 0 : i32
    return %c0_i32, %c0_i32_0 : i32, i32
  }
  func.func @transform_3(%arg0: i32) -> (i32, i32) {
    %c0_i32 = arith.constant 0 : i32
    %c0_i32_0 = arith.constant 0 : i32
    return %arg0, %c0_i32 : i32, i32
  }
}

</mosaic_0001>

<bundles_post_ra>
// kernel: _lr_forward.1
= control target key start
LH: loop header
LB: loop body
LE: loop exit
PB: predicated region body
PF: predicated region fallthrough
CT: control target
= control target key end

     0   :  { %8 = vsyncpa [#allocation3], 0  ;;  %s165_s12 = smov [#allocation2]   ;;  %s200_s0 = inlined_call_operand.hbm [shape: f32[8,24], index: 0, kind: input, shape index: {}]   ;;  %s201_s1 = inlined_call_operand.vmem [shape: f32[2,24], index: 1, kind: input, shape index: {}]   ;;  %s202_s2 = inlined_call_operand.vmem [shape: f32[1,2], index: 2, kind: input, shape index: {}]   ;;  %s203_s3 = inlined_call_operand.vmem [shape: f32[8,2], index: 3, kind: output, shape index: {}]  }
   0x1   :  { %s15_s13 = sshll.u32 %s165_s12, 4  ;;  %s16_s13 = int_to_ptr.vmem [resolvable:$true] %s15_s13 }
   0x2   :  { %s151_s14 = scalar_lea.vmem %s16_s13, 128  ;;  %p156_p1 = scmp.lt.s32.totalorder %s16_s13, %s16_s13 }
   0x3   :  { %p152_p0 = scmp.ne.s32.totalorder %s16_s13, %s151_s14  ;;  %p157_p2 = scmp.lt.s32.totalorder %s151_s14, %s151_s14 }
   0x5   :  { %p158_p3 = por %p157_p2, %p156_p1 }
   0x7   :  { %p159_p4 = pnand %p158_p3, %p152_p0 }
   0x9   :  { %162 = shalt.err (!%p159_p4)
}
   0xa   :  { %18 = dma.hbm_to_vmem [thread:$0]  %s200_s0, 128, %s16_s13, [#allocation3]  }
   0xb   :  { %163 = dma.done.wait [#allocation3], 128  }
   0xc   :  { %164 = vsyncadd [#allocation3], 4294967168  ;;  %v166_v0 = vmov 0.0   ;;  %vm167_vm0 = vmmov 0   ;;  %vm35_vm1 = vcmask 195584   ;;  %v26_v2 = vld [vmem:[#allocation2] sm:$0xff] }
   0xd   :  { %131 = vmatprep.subr.mxu0 %v166_v0  ;;  %133 = vmatprep.mubr.msk.f32.mxu0 %vm167_vm0, %v166_v0  ;;  %v27_v1 = vld [vmem:[%s201_s1] sm:$0x3]  ;;  %vm118_vm2 = vcmask 15360  }
   0xe   :  { %132 = vmatpush3.xpose.msk.msra.mxu0 %vm35_vm1, %v27_v1  ;;  %v125_v3 = vld [vmem:[%s202_s2] ss:$0 sm:$0xff] }
  0x11   :  { %134 = vmatmul.mubr.msk.f32.vlgmr.msra.gmra.mxu0 %vm35_vm1, %v26_v2 }
  0xd1   :  { %v108_v4 = vpop.f32.mrf.mxu0 }
  0xd2   :  { %v109_v5 = vadd.f32 %v125_v3, %v108_v4 }
  0xd3   :  { %v135_v6 = vpop.f32.mrf.mxu0 }
  0xd4   :  { %v128_v7 = vmul.f32 -1.442695, %v109_v5 }
  0xd6   :  { %139 = vpow2.f32 %v128_v7 }
  0xe3   :  { %v140_v8 = vpop.eup %139 }
  0xe4   :  { %v115_v9 = vadd.f32 1.0, %v140_v8 }
  0xe6   :  { %141 = vrcp.f32 %v115_v9 }
  0xf3   :  { %v142_v10 = vpop.eup %141 }
  0xf4   :  { %119 = vst.msk [vmem:[%s203_s3] sm:$0xff] %vm118_vm2, %v142_v10 }
  0xf5   :  { %124 = vsyncpa [#allocation3], 1 }

</bundles_post_ra>
